<compile_context>
chip_gen: v5e
topology: v5e:2x2
jax: 0.10.0
libtpu: 0.0.40
codegen_flags: <defaults>
</compile_context>

<pallas_src>
import functools

import jax
import jax.numpy as jnp
from jax.experimental import pallas as pl
from jax.experimental.pallas import tpu as pltpu

LANE = 128  # pad feature dims to full lanes


def _round_up(v, m):
    return ((v + m - 1) // m) * m


# ----------------------------------------------------------------------------
# Fused Pallas kernel: all GCN layers + mean pool + prediction head
# ----------------------------------------------------------------------------
def _fused_gcn_kernel(num_layers, a_ref, x_ref, w_ref, b_ref, wp_ref, bp_ref,
                      o_ref):
    """a: (N,N) bf16 normalized adjacency
       x: (N,P) bf16 padded node features
       w: (L,P,P) bf16 padded stacked GCN weights
       b: (L,1,P) f32 padded stacked GCN biases
       wp: (L*P, LBLP) f32 padded prediction weight
       bp: (1, LBLP) f32 padded prediction bias
       o: (1, LBLP) f32 padded prediction output."""
    a = a_ref[...]                                   # bf16, stays resident
    n = a_ref.shape[0]
    inv_n = jnp.float32(1.0 / n)

    h_bf16 = x_ref[...]                              # bf16 matmul operand
    pooled = []
    for i in range(num_layers):                      # static unroll (L is small)
        # X @ W on the MXU (bf16 operands, f32 accumulation).
        xw = jnp.dot(h_bf16, w_ref[i], preferred_element_type=jnp.float32)
        # A_hat @ (X W) on the MXU.
        out = jnp.dot(a, xw.astype(jnp.bfloat16),
                      preferred_element_type=jnp.float32)
        out = out + b_ref[i]                         # f32 bias epilogue
        if i < num_layers - 1:                       # conv_last has no activation
            out = jnp.maximum(out, 0.0)
        # Immediate mean-pool over nodes (sublane reduce) -> (1, P).
        pooled.append(jnp.sum(out, axis=0, keepdims=True) * inv_n)
        h_bf16 = out.astype(jnp.bfloat16)            # feed next layer

    pooled_cat = jnp.concatenate(pooled, axis=1)     # (1, L*P), lives in vregs
    ypred = jnp.dot(pooled_cat, wp_ref[...],
                    preferred_element_type=jnp.float32) + bp_ref[...]
    o_ref[...] = ypred.astype(o_ref.dtype)           # lane-dense (1, 128k) store


def fused_gcn_forward(a_norm_bf16, x_pad, w_stack, b_stack, wp_pad, bp_pad,
                      *, num_layers):
    n = a_norm_bf16.shape[0]
    p = x_pad.shape[1]
    lp, lbl_p = wp_pad.shape
    kernel = functools.partial(_fused_gcn_kernel, num_layers)
    return pl.pallas_call(
        kernel,
        out_shape=jax.ShapeDtypeStruct((1, lbl_p), jnp.float32),
        grid=(1,),
        in_specs=[
            pl.BlockSpec((n, n), lambda i: (0, 0)),               # A_hat (bf16)
            pl.BlockSpec((n, p), lambda i: (0, 0)),               # X (bf16, padded)
            pl.BlockSpec((num_layers, p, p), lambda i: (0, 0, 0)),  # W stack (bf16)
            pl.BlockSpec((num_layers, 1, p), lambda i: (0, 0, 0)),  # b stack (f32)
            pl.BlockSpec((lp, lbl_p), lambda i: (0, 0)),           # pred W (f32)
            pl.BlockSpec((1, lbl_p), lambda i: (0, 0)),            # pred b (f32)
        ],
        out_specs=pl.BlockSpec((1, lbl_p), lambda i: (0, 0)),
        compiler_params=pltpu.CompilerParams(
            dimension_semantics=("arbitrary",)),
    )(a_norm_bf16, x_pad, w_stack, b_stack, wp_pad, bp_pad)


# ----------------------------------------------------------------------------
# Parameters (unpadded, PyTorch-like) + padding/stacking for the kernel
# ----------------------------------------------------------------------------
def _glorot(key, shape):
    fan_in, fan_out = shape
    limit = jnp.sqrt(6.0 / (fan_in + fan_out))
    return jax.random.uniform(key, shape, jnp.float32, -limit, limit)


def init_params(key, input_dim, hidden_dim, embedding_dim, label_dim, num_layers):
    keys = jax.random.split(key, num_layers + 1)
    params = {"conv": []}
    in_dims = [input_dim] + [hidden_dim] * (num_layers - 1)
    out_dims = [hidden_dim] * (num_layers - 1) + [embedding_dim]
    for i in range(num_layers):
        params["conv"].append({
            "w": _glorot(keys[i], (in_dims[i], out_dims[i])),
            "b": jnp.zeros((1, out_dims[i]), jnp.float32),
        })
    pred_input_dim = hidden_dim * (num_layers - 1) + embedding_dim
    params["pred"] = {
        "w": _glorot(keys[num_layers], (pred_input_dim, label_dim)),
        "b": jnp.zeros((1, label_dim), jnp.float32),
    }
    params["dims"] = (in_dims, out_dims, label_dim)
    return params


def pad_params(params, num_layers):
    """Zero-pad every feature dim to LANE(=128) lanes and stack layer weights."""
    in_dims, out_dims, label_dim = params["dims"]
    p = _round_up(max(max(in_dims), max(out_dims)), LANE)
    lbl_p = _round_up(label_dim, LANE)

    w_stack = jnp.zeros((num_layers, p, p), jnp.float32)
    b_stack = jnp.zeros((num_layers, 1, p), jnp.float32)
    for i, layer in enumerate(params["conv"]):
        w_stack = w_stack.at[i, :in_dims[i], :out_dims[i]].set(layer["w"])
        b_stack = b_stack.at[i, :, :out_dims[i]].set(layer["b"])

    # Prediction weight: real rows land at their padded (per-layer) lane offsets,
    # so the zero-padded pooled lanes hit zero weight rows.
    wp_pad = jnp.zeros((num_layers * p, lbl_p), jnp.float32)
    off = 0
    for i in range(num_layers):
        wp_pad = wp_pad.at[i * p:i * p + out_dims[i], :label_dim].set(
            params["pred"]["w"][off:off + out_dims[i], :])
        off += out_dims[i]
    bp_pad = jnp.zeros((1, lbl_p), jnp.float32)
    bp_pad = bp_pad.at[:, :label_dim].set(params["pred"]["b"])

    return w_stack.astype(jnp.bfloat16), b_stack, wp_pad, bp_pad, p, lbl_p


def normalize_adj(adj):
    """GCN symmetric normalization with self-loops (PyG gcn_norm, dense), f32."""
    n = adj.shape[0]
    a_hat = adj.astype(jnp.float32) + jnp.eye(n, dtype=jnp.float32)
    deg = jnp.sum(a_hat, axis=1)
    d_inv_sqrt = jnp.where(deg > 0, 1.0 / jnp.sqrt(deg), 0.0)
    return d_inv_sqrt[:, None] * a_hat * d_inv_sqrt[None, :]


def gcn_encoder_graph_forward(params, x, adj, num_layers):
    """Forward pass of GcnEncoderGraph (single graph) via the fused kernel."""
    in_dims, out_dims, label_dim = params["dims"]
    w_stack, b_stack, wp_pad, bp_pad, p, lbl_p = pad_params(params, num_layers)

    a_norm = normalize_adj(adj).astype(jnp.bfloat16)           # f32 norm, bf16 DMA
    x_pad = jnp.zeros((x.shape[0], p), jnp.float32).at[:, :x.shape[1]].set(x)
    x_pad = x_pad.astype(jnp.bfloat16)

    out_padded = fused_gcn_forward(a_norm, x_pad, w_stack, b_stack, wp_pad,
                                   bp_pad, num_layers=num_layers)
    return out_padded[:, :label_dim]                            # [1, label_dim]


# ----------------------------------------------------------------------------
# Pure-JAX reference (f32, unpadded) for correctness checking
# ----------------------------------------------------------------------------
def reference_forward(params, x, adj, num_layers):
    a = normalize_adj(adj)
    h = x
    outs = []
    for i, layer in enumerate(params["conv"]):
        h = a @ (h @ layer["w"]) + layer["b"]
        if i < num_layers - 1:
            h = jnp.maximum(h, 0.0)
        outs.append(h)
    cat = jnp.concatenate(outs, axis=1)
    pooled = jnp.mean(cat, axis=0, keepdims=True)
    return pooled @ params["pred"]["w"] + params["pred"]["b"]


# ----------------------------------------------------------------------------
# Main
# ----------------------------------------------------------------------------
if __name__ == "__main__":
    N = 16             # nodes in the (single) graph
    INPUT_DIM = 8
    HIDDEN_DIM = 32
    EMBEDDING_DIM = 32
    LABEL_DIM = 4
    NUM_LAYERS = 3     # conv_first + 1 conv_block layer + conv_last

    key = jax.random.PRNGKey(0)
    k_x, k_adj, k_params = jax.random.split(key, 3)

    # Node features [N, input_dim].
    x = jax.random.normal(k_x, (N, INPUT_DIM), jnp.float32)

    # Dense symmetric 0/1 adjacency, no self-loops (added inside normalization).
    rand = jax.random.uniform(k_adj, (N, N))
    adj = (rand < 0.3).astype(jnp.float32)
    adj = jnp.maximum(adj, adj.T)
    adj = adj * (1.0 - jnp.eye(N, dtype=jnp.float32))

    params = init_params(k_params, INPUT_DIM, HIDDEN_DIM, EMBEDDING_DIM,
                         LABEL_DIM, NUM_LAYERS)

    ypred = gcn_encoder_graph_forward(params, x, adj, NUM_LAYERS)
    jax.block_until_ready(ypred)

    assert ypred.shape == (1, LABEL_DIM), ypred.shape
    assert bool(jnp.all(jnp.isfinite(ypred)))

    # Loose tolerance: kernel uses bf16 matmul operands (f32 accumulation).
    ref = reference_forward(params, x, adj, NUM_LAYERS)
    assert bool(jnp.allclose(ypred, ref, atol=5e-2, rtol=5e-2)), (ypred, ref)

    print("KERNEL_OK")
</pallas_src>

<mosaic_0001>
module attributes {stable_mosaic.version = 11 : i64} {
  func.func @_fused_gcn_kernel(%arg0: i32, %arg1: memref<16x16xbf16, #tpu.memory_space<vmem>>, %arg2: memref<16x128xbf16, #tpu.memory_space<vmem>>, %arg3: memref<3x128x128xbf16, #tpu.memory_space<vmem>>, %arg4: memref<3x1x128xf32, #tpu.memory_space<vmem>>, %arg5: memref<384x128xf32, #tpu.memory_space<vmem>>, %arg6: memref<1x128xf32, #tpu.memory_space<vmem>>, %arg7: memref<1x128xf32, #tpu.memory_space<vmem>>) attributes {dimension_semantics = [#tpu.dimension_semantics<arbitrary>], iteration_bounds = array<i64: 1>, scalar_prefetch = 0 : i64, scratch_operands = 0 : i64, tpu.core_type = #tpu.core_type<tc>, window_params = [{pipeline_mode = #tpu.pipeline_mode<synchronous>, transform_indices = @transform_0, window_bounds = array<i64: 16, 16>}, {pipeline_mode = #tpu.pipeline_mode<synchronous>, transform_indices = @transform_1, window_bounds = array<i64: 16, 128>}, {pipeline_mode = #tpu.pipeline_mode<synchronous>, transform_indices = @transform_2, window_bounds = array<i64: 3, 128, 128>}, {pipeline_mode = #tpu.pipeline_mode<synchronous>, transform_indices = @transform_3, window_bounds = array<i64: 3, 1, 128>}, {pipeline_mode = #tpu.pipeline_mode<synchronous>, transform_indices = @transform_4, window_bounds = array<i64: 384, 128>}, {pipeline_mode = #tpu.pipeline_mode<synchronous>, transform_indices = @transform_5, window_bounds = array<i64: 1, 128>}, {pipeline_mode = #tpu.pipeline_mode<synchronous>, transform_indices = @transform_6, window_bounds = array<i64: 1, 128>}]} {
    %c0 = arith.constant 0 : index
    %c0_0 = arith.constant 0 : index
    %0 = vector.load %arg1[%c0, %c0_0] : memref<16x16xbf16, #tpu.memory_space<vmem>>, vector<16x16xbf16>
    %c0_1 = arith.constant 0 : index
    %c0_2 = arith.constant 0 : index
    %1 = vector.load %arg2[%c0_1, %c0_2] : memref<16x128xbf16, #tpu.memory_space<vmem>>, vector<16x128xbf16>
    %c0_3 = arith.constant 0 : index
    %c0_4 = arith.constant 0 : index
    %c0_5 = arith.constant 0 : index
    %2 = vector.load %arg3[%c0_3, %c0_4, %c0_5] : memref<3x128x128xbf16, #tpu.memory_space<vmem>>, vector<1x128x128xbf16>
    %3 = vector.shape_cast %2 : vector<1x128x128xbf16> to vector<128x128xbf16>
    %cst = arith.constant dense<0.000000e+00> : vector<16x128xf32>
    %4 = tpu.matmul %1, %3, %cst {dimension_numbers = #tpu.dot_dimension_numbers<[1], [0], [0], [1], [0, 0, 1, 1], [], []>} : vector<16x128xbf16>, vector<128x128xbf16>, vector<16x128xf32> -> vector<16x128xf32>
    %5 = arith.truncf %4 : vector<16x128xf32> to vector<16x128xbf16>
    %cst_6 = arith.constant dense<0.000000e+00> : vector<16x128xf32>
    %6 = tpu.matmul %0, %5, %cst_6 {dimension_numbers = #tpu.dot_dimension_numbers<[1], [0], [0], [1], [0, 0, 1, 1], [], []>} : vector<16x16xbf16>, vector<16x128xbf16>, vector<16x128xf32> -> vector<16x128xf32>
    %c0_7 = arith.constant 0 : index
    %c0_8 = arith.constant 0 : index
    %c0_9 = arith.constant 0 : index
    %7 = vector.load %arg4[%c0_7, %c0_8, %c0_9] : memref<3x1x128xf32, #tpu.memory_space<vmem>>, vector<1x1x128xf32>
    %8 = vector.shape_cast %7 : vector<1x1x128xf32> to vector<1x128xf32>
    %9 = vector.broadcast %8 : vector<1x128xf32> to vector<16x128xf32>
    %10 = arith.addf %6, %9 : vector<16x128xf32>
    %cst_10 = arith.constant 0.000000e+00 : f32
    %11 = vector.broadcast %cst_10 : f32 to vector<16x128xf32>
    %12 = arith.maximumf %10, %11 : vector<16x128xf32>
    %cst_11 = arith.constant dense<0.000000e+00> : vector<128xf32>
    %13 = vector.multi_reduction <add>, %12, %cst_11 [0] : vector<16x128xf32> to vector<128xf32>
    %14 = vector.shape_cast %13 : vector<128xf32> to vector<1x128xf32>
    %cst_12 = arith.constant 6.250000e-02 : f32
    %15 = vector.broadcast %cst_12 : f32 to vector<1x128xf32>
    %16 = arith.mulf %14, %15 : vector<1x128xf32>
    %17 = arith.truncf %12 : vector<16x128xf32> to vector<16x128xbf16>
    %c1 = arith.constant 1 : index
    %c0_13 = arith.constant 0 : index
    %c0_14 = arith.constant 0 : index
    %18 = vector.load %arg3[%c1, %c0_13, %c0_14] : memref<3x128x128xbf16, #tpu.memory_space<vmem>>, vector<1x128x128xbf16>
    %19 = vector.shape_cast %18 : vector<1x128x128xbf16> to vector<128x128xbf16>
    %cst_15 = arith.constant dense<0.000000e+00> : vector<16x128xf32>
    %20 = tpu.matmul %17, %19, %cst_15 {dimension_numbers = #tpu.dot_dimension_numbers<[1], [0], [0], [1], [0, 0, 1, 1], [], []>} : vector<16x128xbf16>, vector<128x128xbf16>, vector<16x128xf32> -> vector<16x128xf32>
    %21 = arith.truncf %20 : vector<16x128xf32> to vector<16x128xbf16>
    %cst_16 = arith.constant dense<0.000000e+00> : vector<16x128xf32>
    %22 = tpu.matmul %0, %21, %cst_16 {dimension_numbers = #tpu.dot_dimension_numbers<[1], [0], [0], [1], [0, 0, 1, 1], [], []>} : vector<16x16xbf16>, vector<16x128xbf16>, vector<16x128xf32> -> vector<16x128xf32>
    %c1_17 = arith.constant 1 : index
    %c0_18 = arith.constant 0 : index
    %c0_19 = arith.constant 0 : index
    %23 = vector.load %arg4[%c1_17, %c0_18, %c0_19] : memref<3x1x128xf32, #tpu.memory_space<vmem>>, vector<1x1x128xf32>
    %24 = vector.shape_cast %23 : vector<1x1x128xf32> to vector<1x128xf32>
    %25 = vector.broadcast %24 : vector<1x128xf32> to vector<16x128xf32>
    %26 = arith.addf %22, %25 : vector<16x128xf32>
    %cst_20 = arith.constant 0.000000e+00 : f32
    %27 = vector.broadcast %cst_20 : f32 to vector<16x128xf32>
    %28 = arith.maximumf %26, %27 : vector<16x128xf32>
    %cst_21 = arith.constant dense<0.000000e+00> : vector<128xf32>
    %29 = vector.multi_reduction <add>, %28, %cst_21 [0] : vector<16x128xf32> to vector<128xf32>
    %30 = vector.shape_cast %29 : vector<128xf32> to vector<1x128xf32>
    %cst_22 = arith.constant 6.250000e-02 : f32
    %31 = vector.broadcast %cst_22 : f32 to vector<1x128xf32>
    %32 = arith.mulf %30, %31 : vector<1x128xf32>
    %33 = arith.truncf %28 : vector<16x128xf32> to vector<16x128xbf16>
    %c2 = arith.constant 2 : index
    %c0_23 = arith.constant 0 : index
    %c0_24 = arith.constant 0 : index
    %34 = vector.load %arg3[%c2, %c0_23, %c0_24] : memref<3x128x128xbf16, #tpu.memory_space<vmem>>, vector<1x128x128xbf16>
    %35 = vector.shape_cast %34 : vector<1x128x128xbf16> to vector<128x128xbf16>
    %cst_25 = arith.constant dense<0.000000e+00> : vector<16x128xf32>
    %36 = tpu.matmul %33, %35, %cst_25 {dimension_numbers = #tpu.dot_dimension_numbers<[1], [0], [0], [1], [0, 0, 1, 1], [], []>} : vector<16x128xbf16>, vector<128x128xbf16>, vector<16x128xf32> -> vector<16x128xf32>
    %37 = arith.truncf %36 : vector<16x128xf32> to vector<16x128xbf16>
    %cst_26 = arith.constant dense<0.000000e+00> : vector<16x128xf32>
    %38 = tpu.matmul %0, %37, %cst_26 {dimension_numbers = #tpu.dot_dimension_numbers<[1], [0], [0], [1], [0, 0, 1, 1], [], []>} : vector<16x16xbf16>, vector<16x128xbf16>, vector<16x128xf32> -> vector<16x128xf32>
    %c2_27 = arith.constant 2 : index
    %c0_28 = arith.constant 0 : index
    %c0_29 = arith.constant 0 : index
    %39 = vector.load %arg4[%c2_27, %c0_28, %c0_29] : memref<3x1x128xf32, #tpu.memory_space<vmem>>, vector<1x1x128xf32>
    %40 = vector.shape_cast %39 : vector<1x1x128xf32> to vector<1x128xf32>
    %41 = vector.broadcast %40 : vector<1x128xf32> to vector<16x128xf32>
    %42 = arith.addf %38, %41 : vector<16x128xf32>
    %cst_30 = arith.constant dense<0.000000e+00> : vector<128xf32>
    %43 = vector.multi_reduction <add>, %42, %cst_30 [0] : vector<16x128xf32> to vector<128xf32>
    %44 = vector.shape_cast %43 : vector<128xf32> to vector<1x128xf32>
    %cst_31 = arith.constant 6.250000e-02 : f32
    %45 = vector.broadcast %cst_31 : f32 to vector<1x128xf32>
    %46 = arith.mulf %44, %45 : vector<1x128xf32>
    %47 = tpu.concatenate %16, %32, %46 in 1 : vector<1x128xf32>, vector<1x128xf32>, vector<1x128xf32> -> vector<1x384xf32>
    %c0_32 = arith.constant 0 : index
    %c0_33 = arith.constant 0 : index
    %48 = vector.load %arg5[%c0_32, %c0_33] : memref<384x128xf32, #tpu.memory_space<vmem>>, vector<384x128xf32>
    %cst_34 = arith.constant dense<0.000000e+00> : vector<1x128xf32>
    %49 = tpu.matmul %47, %48, %cst_34 {dimension_numbers = #tpu.dot_dimension_numbers<[1], [0], [0], [1], [0, 0, 1, 1], [], []>} : vector<1x384xf32>, vector<384x128xf32>, vector<1x128xf32> -> vector<1x128xf32>
    %c0_35 = arith.constant 0 : index
    %c0_36 = arith.constant 0 : index
    %50 = vector.load %arg6[%c0_35, %c0_36] : memref<1x128xf32, #tpu.memory_space<vmem>>, vector<1x128xf32>
    %51 = arith.addf %49, %50 : vector<1x128xf32>
    %c0_37 = arith.constant 0 : index
    %c0_38 = arith.constant 0 : index
    %52 = vector.load %arg7[%c0_37, %c0_38] : memref<1x128xf32, #tpu.memory_space<vmem>>, vector<1x128xf32>
    tpu.vector_store %arg7[%c0_37, %c0_38], %51 {strides = array<i32>} : memref<1x128xf32, #tpu.memory_space<vmem>>, vector<1x128xf32>,
    return
  }
  func.func @transform_0(%arg0: i32) -> (i32, i32) {
    %c0_i32 = arith.constant 0 : i32
    %c0_i32_0 = arith.constant 0 : i32
    %c0_i32_1 = arith.constant 0 : i32
    return %c0_i32, %c0_i32_0 : i32, i32
  }
  func.func @transform_1(%arg0: i32) -> (i32, i32) {
    %c0_i32 = arith.constant 0 : i32
    %c0_i32_0 = arith.constant 0 : i32
    %c0_i32_1 = arith.constant 0 : i32
    return %c0_i32, %c0_i32_0 : i32, i32
  }
  func.func @transform_2(%arg0: i32) -> (i32, i32, i32) {
    %c0_i32 = arith.constant 0 : i32
    %c0_i32_0 = arith.constant 0 : i32
    %c0_i32_1 = arith.constant 0 : i32
    %c0_i32_2 = arith.constant 0 : i32
    return %c0_i32, %c0_i32_0, %c0_i32_1 : i32, i32, i32
  }
  func.func @transform_3(%arg0: i32) -> (i32, i32, i32) {
    %c0_i32 = arith.constant 0 : i32
    %c0_i32_0 = arith.constant 0 : i32
    %c0_i32_1 = arith.constant 0 : i32
    %c0_i32_2 = arith.constant 0 : i32
    return %c0_i32, %c0_i32_0, %c0_i32_1 : i32, i32, i32
  }
  func.func @transform_4(%arg0: i32) -> (i32, i32) {
    %c0_i32 = arith.constant 0 : i32
    %c0_i32_0 = arith.constant 0 : i32
    %c0_i32_1 = arith.constant 0 : i32
    return %c0_i32, %c0_i32_0 : i32, i32
  }
  func.func @transform_5(%arg0: i32) -> (i32, i32) {
    %c0_i32 = arith.constant 0 : i32
    %c0_i32_0 = arith.constant 0 : i32
    %c0_i32_1 = arith.constant 0 : i32
    return %c0_i32, %c0_i32_0 : i32, i32
  }
  func.func @transform_6(%arg0: i32) -> (i32, i32) {
    %c0_i32 = arith.constant 0 : i32
    %c0_i32_0 = arith.constant 0 : i32
    %c0_i32_1 = arith.constant 0 : i32
    return %c0_i32, %c0_i32_0 : i32, i32
  }
}

</mosaic_0001>

<bundles_post_ra>
// kernel: tpu_custom_call.1
= control target key start
LH: loop header
LB: loop body
LE: loop exit
PB: predicated region body
PF: predicated region fallthrough
CT: control target
= control target key end

     0   :  { %11 = vsyncpa [#allocation3], 0  ;;  %s956_s0 = inlined_call_operand.hbm [shape: bf16[16,16], index: 0, kind: input, shape index: {}]   ;;  %s957_s1 = inlined_call_operand.hbm [shape: bf16[16,128], index: 1, kind: input, shape index: {}]   ;;  %s958_s2 = inlined_call_operand.hbm [shape: bf16[3,128,128], index: 2, kind: input, shape index: {}]   ;;  %s959_s3 = inlined_call_operand.hbm [shape: f32[3,1,128], index: 3, kind: input, shape index: {}]   ;;  %s960_s4 = inlined_call_operand.hbm [shape: f32[384,128], index: 4, kind: input, shape index: {}]   ;;  %s961_s5 = inlined_call_operand.vmem [shape: f32[1,128], index: 5, kind: input, shape index: {}]   ;;  %s962_s6 = inlined_call_operand.hbm [shape: f32[1,128], index: 6, kind: output, shape index: {}]  }
   0x1   :  { %12 = vsyncpa [#allocation6], 0 }
   0x2   :  { %13 = vsyncpa [#allocation9], 0 }
   0x3   :  { %14 = vsyncpa [#allocation4], 0  ;;  %s32_s23 = sshll.u32 %s957_s1, 4  ;;  %s876_s24 = smov [#allocation5]   ;;  %s33_s23 = int_to_ptr.hbm [resolvable:$true] %s32_s23 }
   0x4   :  { %s34_s25 = sshll.u32 %s876_s24, 4  ;;  %s58_s28 = sshll.u32 %s959_s3, 4  ;;  %s35_s25 = int_to_ptr.vmem [resolvable:$true] %s34_s25  ;;  %s59_s28 = int_to_ptr.hbm [resolvable:$true] %s58_s28 }
   0x5   :  { %s877_s29 = smov 64   ;;  %s878_s30 = smov 4  }
   0x6   :  { %40 = dma.hbm_to_vmem [thread:$0]  %s33_s23, 128, %s35_s25, [#allocation6], %s877_s29, %s877_s29, %s878_s30  }
   0x7   :  { %s879_s7 = smov [#allocation8]   ;;  %s880_s9 = smov 16  }
   0x8   :  { %s60_s8 = sshll.u32 %s879_s7, 4  ;;  %s881_s10 = smov 1   ;;  %s61_s8 = int_to_ptr.vmem [resolvable:$true] %s60_s8 }
   0x9   :  { %66 = dma.hbm_to_vmem [thread:$0]  %s59_s28, 48, %s61_s8, [#allocation9], %s880_s9, %s880_s9, %s881_s10  }
   0xa   :  { %s19_s12 = sshll.u32 %s956_s0, 4  ;;  %s882_s13 = smov [#allocation2]   ;;  %s20_s12 = int_to_ptr.hbm [resolvable:$true] %s19_s12 }
   0xb   :  { %s21_s14 = sshll.u32 %s882_s13, 4  ;;  %s45_s16 = sshll.u32 %s958_s2, 4  ;;  %s22_s14 = int_to_ptr.vmem [resolvable:$true] %s21_s14  ;;  %s46_s16 = int_to_ptr.hbm [resolvable:$true] %s45_s16 }
   0xc   :  { %27 = dma.hbm_to_vmem [thread:$0]  %s20_s12, 128, %s22_s14, [#allocation3], %s877_s29, %s877_s29, %s878_s30  }
   0xd   :  { %s883_s17 = smov [#allocation7]   ;;  %s71_s21 = sshll.u32 %s960_s4, 4  ;;  %s72_s21 = int_to_ptr.hbm [resolvable:$true] %s71_s21 }
   0xe   :  { %s47_s18 = sshll.u32 %s883_s17, 4  ;;  %s884_s0 = smov [#allocation10]   ;;  %s48_s18 = int_to_ptr.vmem [resolvable:$true] %s47_s18 }
   0xf   :  { %53 = dma.hbm_to_vmem [thread:$0]  %s46_s16, 3072, %s48_s18, [#allocation6], %s877_s29, %s877_s29, %s878_s30  }
  0x10   :  { %s73_s22 = sshll.u32 %s884_s0, 4  ;;  %s885_s23 = smov 128   ;;  %s74_s22 = int_to_ptr.vmem [resolvable:$true] %s73_s22 }
  0x11   :  { %s886_s24 = smov 8  }
  0x12   :  { %79 = dma.hbm_to_vmem [thread:$0]  %s72_s21, 6144, %s74_s22, [#allocation9], %s885_s23, %s885_s23, %s886_s24  }
  0x13   :  { %868 = dma.done.wait [#allocation3], 128  }
  0x14   :  { %869 = vsyncadd [#allocation3], 4294967168 }
  0x15   :  { %870 = dma.done.wait [#allocation6], 3200  }
  0x16   :  { %871 = vsyncadd [#allocation6], 4294964096 }
  0x17   :  { %872 = dma.done.wait [#allocation9], 6192  }
  0x18   :  { %873 = vsyncadd [#allocation9], 4294961104  ;;  %v692_v0 = vld [vmem:[#allocation7 + $0x38] sm:$0xff]  ;;  %v691_v1 = vld [vmem:[#allocation7 + $0x30] sm:$0xff]  ;;  %vm201_vm0 = vcmask 130048   ;;  %s887_s25 = smov [#allocation11]  }
  0x19   :  { %177 = vmatpush.bf16.msra.mxu0 %v692_v0  ;;  %v690_v2 = vld [vmem:[#allocation7 + $0x28] sm:$0xff]  ;;  %v689_v3 = vld [vmem:[#allocation7 + $0x20] sm:$0xff]  ;;  %v688_v4 = vld [vmem:[#allocation7 + $0x18] sm:$0xff]  ;;  %s562_s26 = sshll.u32 %s887_s25, 4  ;;  %s564_s29 = sshll.u32 %s962_s6, 4  ;;  %s563_s26 = int_to_ptr.vmem [resolvable:$true] %s562_s26  ;;  %s565_s29 = int_to_ptr.hbm [resolvable:$true] %s564_s29 }
  0x1a   :  { %v687_v5 = vld [vmem:[#allocation7 + $0x10] sm:$0xff]  ;;  %v686_v6 = vld [vmem:[#allocation7 + $0x8] sm:$0xff]  ;;  %v685_v7 = vld [vmem:[#allocation7] sm:$0xff] }
  0x1b   :  { %v684_v8 = vld [vmem:[#allocation5] sm:$0xff]  ;;  %v699_v10 = vld [vmem:[#allocation7 + $0x70] sm:$0xff]  ;;  %v698_v11 = vld [vmem:[#allocation7 + $0x68] sm:$0xff] }
  0x1c   :  { %v700_v9 = vld [vmem:[#allocation7 + $0x78] sm:$0xff]  ;;  %v697_v12 = vld [vmem:[#allocation7 + $0x60] sm:$0xff]  ;;  %v938_v16 = vld [vmem:[#allocation2] sm:$0xff] }
  0x1d   :  { %178 = vmatpush.bf16.msra.mxu0 %v691_v1  ;;  %295 = vmatpush.bf16.msra.mxu2 %v700_v9  ;;  %v696_v17 = vld [vmem:[#allocation7 + $0x58] sm:$0xff]  ;;  %v695_v18 = vld [vmem:[#allocation7 + $0x50] sm:$0xff]  ;;  %v694_v19 = vld [vmem:[#allocation7 + $0x48] sm:$0xff] }
  0x1e   :  { %v693_v20 = vld [vmem:[#allocation7 + $0x40] sm:$0xff]  ;;  %v708_v30 = vld [vmem:[#allocation7 + $0xb8] sm:$0xff]  ;;  %v707_v32 = vld [vmem:[#allocation7 + $0xb0] sm:$0xff] }
  0x1f   :  { %v721_v22 = vld [vmem:[#allocation8] ss:$0 sm:$0xff]  ;;  %v706_v33 = vld [vmem:[#allocation7 + $0xa8] sm:$0xff]  ;;  %v704_v38 = vld [vmem:[#allocation7 + $0x98] sm:$0xff] }
  0x20   :  { %v478_v31 = vld [vmem:[#allocation10 + $0xf8] sm:$0xff]  ;;  %v477_v39 = vld [vmem:[#allocation10 + $0xf0] sm:$0xff]  ;;  %v476_v40 = vld [vmem:[#allocation10 + $0xe8] sm:$0xff] }
  0x21   :  { %179 = vmatpush.bf16.msra.mxu0 %v690_v2  ;;  %296 = vmatpush.bf16.msra.mxu2 %v699_v10  ;;  %v705_v34 = vld [vmem:[#allocation7 + $0xa0] sm:$0xff]  ;;  %v703_v41 = vld [vmem:[#allocation7 + $0x90] sm:$0xff]  ;;  %v702_v44 = vld [vmem:[#allocation7 + $0x88] sm:$0xff] }
  0x22   :  { %v475_v42 = vld [vmem:[#allocation10 + $0xe0] sm:$0xff]  ;;  %v474_v43 = vld [vmem:[#allocation10 + $0xd8] sm:$0xff]  ;;  %v473_v45 = vld [vmem:[#allocation10 + $0xd0] sm:$0xff] }
  0x23   :  { %v472_v46 = vld [vmem:[#allocation10 + $0xc8] sm:$0xff]  ;;  %v701_v47 = vld [vmem:[#allocation7 + $0x80] sm:$0xff]  ;;  %v469_v50 = vld [vmem:[#allocation10 + $0xb0] sm:$0xff] }
  0x24   :  { %v471_v48 = vld [vmem:[#allocation10 + $0xc0] sm:$0xff]  ;;  %v470_v49 = vld [vmem:[#allocation10 + $0xb8] sm:$0xff]  ;;  %v468_v51 = vld [vmem:[#allocation10 + $0xa8] sm:$0xff] }
  0x25   :  { %180 = vmatpush.bf16.msra.mxu0 %v689_v3  ;;  %297 = vmatpush.bf16.msra.mxu2 %v698_v11  ;;  %v467_v52 = vld [vmem:[#allocation10 + $0xa0] sm:$0xff]  ;;  %v466_v53 = vld [vmem:[#allocation10 + $0x98] sm:$0xff]  ;;  %v465_v54 = vld [vmem:[#allocation10 + $0x90] sm:$0xff] }
  0x26   :  { %v464_v55 = vld [vmem:[#allocation10 + $0x88] sm:$0xff]  ;;  %v463_v56 = vld [vmem:[#allocation10 + $0x80] sm:$0xff]  ;;  %v722_v58 = vld [vmem:[#allocation8 + $0x1] ss:$0 sm:$0xff] }
  0x29   :  { %181 = vmatpush.bf16.msra.mxu0 %v688_v4  ;;  %298 = vmatpush.bf16.msra.mxu2 %v697_v12  ;;  %v462_v12 = vld [vmem:[#allocation10 + $0x78] sm:$0xff] }
  0x2d   :  { %182 = vmatpush.bf16.msra.mxu0 %v687_v5  ;;  %299 = vmatpush.bf16.msra.mxu2 %v696_v17  ;;  %v460_v17 = vld [vmem:[#allocation10 + $0x68] sm:$0xff] }
  0x31   :  { %183 = vmatpush.bf16.msra.mxu0 %v686_v6  ;;  %300 = vmatpush.bf16.msra.mxu2 %v695_v18  ;;  %v459_v18 = vld [vmem:[#allocation10 + $0x60] sm:$0xff] }
  0x35   :  { %184 = vmatpush.bf16.msra.mxu0 %v685_v7  ;;  %301 = vmatpush.bf16.msra.mxu2 %v694_v19 }
  0x38   :  { %185 = vmatmul.bf16.vlgmr.msra.gmra.mxu0 %v684_v8 }
  0x39   :  { %302 = vmatpush.bf16.msra.mxu2 %v693_v20  ;;  %516 = vmatpush.msrb.mxu0 %v478_v31  ;;  %v458_v20 = vld [vmem:[#allocation10 + $0x58] sm:$0xff] }
  0x3b   :  { %517 = vmatpush.msrb.mxu0 %v477_v39  ;;  %v490_v39 = vld [vmem:[#allocation10 + $0x158] sm:$0xff] }
  0x3d   :  { %518 = vmatpush.msrb.mxu0 %v476_v40  ;;  %v489_v40 = vld [vmem:[#allocation10 + $0x150] sm:$0xff] }
  0x3f   :  { %519 = vmatpush.msrb.mxu0 %v475_v42  ;;  %v487_v42 = vld [vmem:[#allocation10 + $0x140] sm:$0xff] }
  0x41   :  { %520 = vmatpush.msrb.mxu0 %v474_v43  ;;  %v486_v43 = vld [vmem:[#allocation10 + $0x138] sm:$0xff] }
  0x43   :  { %521 = vmatpush.msrb.mxu0 %v473_v45  ;;  %v484_v45 = vld [vmem:[#allocation10 + $0x128] sm:$0xff] }
  0x45   :  { %522 = vmatpush.msrb.mxu0 %v472_v46  ;;  %v483_v46 = vld [vmem:[#allocation10 + $0x120] sm:$0xff] }
  0x47   :  { %523 = vmatpush.msrb.mxu0 %v471_v48  ;;  %v481_v48 = vld [vmem:[#allocation10 + $0x110] sm:$0xff] }
  0x49   :  { %524 = vmatpush.msrb.mxu0 %v470_v49  ;;  %v480_v49 = vld [vmem:[#allocation10 + $0x108] sm:$0xff] }
  0x4b   :  { %525 = vmatpush.msrb.mxu0 %v469_v50  ;;  %v479_v50 = vld [vmem:[#allocation10 + $0x100] sm:$0xff] }
  0x4d   :  { %526 = vmatpush.msrb.mxu0 %v468_v51 }
  0x4f   :  { %527 = vmatpush.msrb.mxu0 %v467_v52  ;;  %v723_v52 = vld [vmem:[#allocation8 + $0x2] ss:$0 sm:$0xff] }
  0x51   :  { %528 = vmatpush.msrb.mxu0 %v466_v53 }
  0x53   :  { %529 = vmatpush.msrb.mxu0 %v465_v54 }
  0x55   :  { %530 = vmatpush.msrb.mxu0 %v464_v55 }
  0x57   :  { %531 = vmatpush.msrb.mxu0 %v463_v56 }
  0xb5   :  { %v186_v13 = vpop.f32.mrf.mxu0 }
  0xbd   :  { %v188_v14 = vpop.f32.mrf.mxu0 }
  0xbe   :  { %v191_v15 = vpack.c.bf16 %v188_v14, %v186_v13  ;;  %v461_v13 = vld [vmem:[#allocation10 + $0x70] sm:$0xff]  ;;  %v494_v14 = vld [vmem:[#allocation10 + $0x178] sm:$0xff] }
  0xbf   :  { %536 = vmatpush.msrb.mxu2 %v494_v14 }
  0xc0   :  { %212 = vmatpush.bf16.msra.mxu1 %v191_v15  ;;  %v493_v15 = vld [vmem:[#allocation10 + $0x170] sm:$0xff] }
  0xc1   :  { %537 = vmatpush.msrb.mxu2 %v493_v15 }
  0xc3   :  { %616 = vmatmul.msk.bf16.vlgmr.msra.gmra.mxu1 %vm201_vm0, %v938_v16 }
  0xc4   :  { %405 = vmatpush.bf16.msrb.mxu1 %v708_v30  ;;  %v451_v30 = vld [vmem:[#allocation10 + $0x20] sm:$0xff] }
  0xc8   :  { %406 = vmatpush.bf16.msrb.mxu1 %v707_v32  ;;  %v450_v32 = vld [vmem:[#allocation10 + $0x18] sm:$0xff] }
  0xcc   :  { %407 = vmatpush.bf16.msrb.mxu1 %v706_v33  ;;  %v449_v33 = vld [vmem:[#allocation10 + $0x10] sm:$0xff] }
  0xd0   :  { %408 = vmatpush.bf16.msrb.mxu1 %v705_v34 }
  0xd4   :  { %409 = vmatpush.bf16.msrb.mxu1 %v704_v38  ;;  %v491_v38 = vld [vmem:[#allocation10 + $0x160] sm:$0xff] }
  0xd8   :  { %410 = vmatpush.bf16.msrb.mxu1 %v703_v41  ;;  %v488_v41 = vld [vmem:[#allocation10 + $0x148] sm:$0xff] }
  0xdc   :  { %411 = vmatpush.bf16.msrb.mxu1 %v702_v44  ;;  %v485_v44 = vld [vmem:[#allocation10 + $0x130] sm:$0xff] }
  0xe0   :  { %412 = vmatpush.bf16.msrb.mxu1 %v701_v47  ;;  %v482_v47 = vld [vmem:[#allocation10 + $0x118] sm:$0xff] }
 0x140   :  { %v214_v21 = vpop.f32.mrf.mxu1 }
 0x141   :  { %v215_v23 = vadd.f32 %v721_v22, %v214_v21  ;;  %v457_v21 = vld [vmem:[#allocation10 + $0x50] sm:$0xff] }
 0x143   :  { %v219_v26 = vmax.f32 %v215_v23, 0.0  ;;  %v456_v23 = vld [vmem:[#allocation10 + $0x48] sm:$0xff] }
 0x148   :  { %v216_v24 = vpop.f32.mrf.mxu1 }
 0x149   :  { %v217_v25 = vadd.f32 %v721_v22, %v216_v24  ;;  %v455_v24 = vld [vmem:[#allocation10 + $0x40] sm:$0xff] }
 0x14b   :  { %v220_v27 = vmax.f32 %v217_v25, 0.0 }
 0x14d   :  { %v942_v28 = vadd.f32 %v220_v27, %v219_v26  ;;  %v229_v29 = vpack.c.bf16 %v220_v27, %v219_v26  ;;  %v454_v26 = vld [vmem:[#allocation10 + $0x38] sm:$0xff] }
 0x14f   :  { %303 = vmatmul.bf16.vlgmr.msra.gmra.mxu2 %v229_v29  ;;  %v222_v19 = vrot.slane %v942_v28, 4  ;;  %v452_v29 = vld [vmem:[#allocation10 + $0x28] sm:$0xff] }
 0x151   :  { %v223_v22 = vadd.f32 %v222_v19, %v942_v28  ;;  %v448_v28 = vld [vmem:[#allocation10 + $0x8] sm:$0xff] }
 0x153   :  { %v224_v25 = vrot.slane %v223_v22, 2 }
 0x155   :  { %v225_v27 = vadd.f32 %v224_v25, %v223_v22 }
 0x157   :  { %v226_v31 = vrot.slane %v225_v27, 1 }
 0x159   :  { %v227_v34 = vadd.f32 %v226_v31, %v225_v27 }
 0x1d2   :  { %v304_v35 = vpop.f32.mrf.mxu2 }
 0x1da   :  { %v306_v36 = vpop.f32.mrf.mxu2 }
 0x1db   :  { %v309_v37 = vpack.c.bf16 %v306_v36, %v304_v35  ;;  %v447_v35 = vld [vmem:[#allocation10] sm:$0xff]  ;;  %v228_v36 = vmul.f32 0.0625, %v227_v34 }
 0x1dd   :  { %322 = vmatpush.bf16.msra.mxu3 %v309_v37  ;;  %v492_v37 = vld [vmem:[#allocation10 + $0x168] sm:$0xff] }
 0x1de   :  { %538 = vmatpush.msrb.mxu2 %v492_v37 }
 0x1e0   :  { %649 = vmatmul.msk.bf16.vlgmr.msra.gmra.mxu3 %vm201_vm0, %v938_v16  ;;  %539 = vmatpush.msrb.mxu2 %v491_v38 }
 0x1e2   :  { %540 = vmatpush.msrb.mxu2 %v490_v39 }
 0x1e4   :  { %541 = vmatpush.msrb.mxu2 %v489_v40 }
 0x1e6   :  { %542 = vmatpush.msrb.mxu2 %v488_v41 }
 0x1e8   :  { %543 = vmatpush.msrb.mxu2 %v487_v42 }
 0x1ea   :  { %544 = vmatpush.msrb.mxu2 %v486_v43 }
 0x1ec   :  { %545 = vmatpush.msrb.mxu2 %v485_v44 }
 0x1ee   :  { %546 = vmatpush.msrb.mxu2 %v484_v45 }
 0x1f0   :  { %547 = vmatpush.msrb.mxu2 %v483_v46 }
 0x1f2   :  { %548 = vmatpush.msrb.mxu2 %v482_v47 }
 0x1f4   :  { %549 = vmatpush.msrb.mxu2 %v481_v48 }
 0x1f6   :  { %550 = vmatpush.msrb.mxu2 %v480_v49 }
 0x1f8   :  { %551 = vmatpush.msrb.mxu2 %v479_v50 }
 0x263   :  { %v324_v57 = vpop.f32.mrf.mxu3 }
 0x264   :  { %v325_v59 = vadd.f32 %v722_v58, %v324_v57 }
 0x266   :  { %v329_v62 = vmax.f32 %v325_v59, 0.0 }
 0x26b   :  { %v326_v60 = vpop.f32.mrf.mxu3 }
 0x26c   :  { %v327_v61 = vadd.f32 %v722_v58, %v326_v60 }
 0x26e   :  { %v330_v63 = vmax.f32 %v327_v61, 0.0 }
 0x270   :  { %v331_v0 = vadd.f32 %v330_v63, %v329_v62  ;;  %v339_v1 = vpack.c.bf16 %v330_v63, %v329_v62 }
 0x272   :  { %v332_v2 = vrot.slane %v331_v0, 4  ;;  %413 = vmatmul.bf16.vlgmr.msrb.gmra.mxu1 %v339_v1 }
 0x274   :  { %v333_v3 = vadd.f32 %v332_v2, %v331_v0  ;;  %v495_v0 = vld [vmem:[%s961_s5] sm:$0x1] }
 0x276   :  { %v334_v4 = vrot.slane %v333_v3, 2 }
 0x278   :  { %v335_v5 = vadd.f32 %v334_v4, %v333_v3 }
 0x27a   :  { %v336_v6 = vrot.slane %v335_v5, 1 }
 0x27c   :  { %v337_v7 = vadd.f32 %v336_v6, %v335_v5 }
 0x27e   :  { %v338_v8 = vmul.f32 0.0625, %v337_v7 }
 0x280   :  { %532 = vmatmul.f32.vlgmr.msrb.gmra.mxu0 %v338_v8 }
 0x2ef   :  { %v414_v9 = vpop.f32.mrf.mxu1 }
 0x2f7   :  { %v416_v10 = vpop.f32.mrf.mxu1 }
 0x2f8   :  { %v419_v11 = vpack.c.bf16 %v416_v10, %v414_v9 }
 0x2fa   :  { %432 = vmatpush.bf16.msrb.mxu3 %v419_v11 }
 0x2fd   :  { %682 = vmatmul.msk.bf16.vlgmr.msrb.gmra.mxu3 %vm201_vm0, %v938_v16  ;;  %v453_v16 = vld [vmem:[#allocation10 + $0x30] sm:$0xff]  ;;  %v533_v3 = vpop.f32.mrf.mxu0 }
 0x2fe   :  { %496 = vmatpush.msra.mxu3 %v462_v12 }
 0x300   :  { %497 = vmatpush.msra.mxu3 %v461_v13 }
 0x302   :  { %498 = vmatpush.msra.mxu3 %v460_v17 }
 0x304   :  { %499 = vmatpush.msra.mxu3 %v459_v18 }
 0x306   :  { %500 = vmatpush.msra.mxu3 %v458_v20 }
 0x308   :  { %501 = vmatpush.msra.mxu3 %v457_v21 }
 0x30a   :  { %502 = vmatpush.msra.mxu3 %v456_v23 }
 0x30c   :  { %503 = vmatpush.msra.mxu3 %v455_v24 }
 0x30e   :  { %504 = vmatpush.msra.mxu3 %v454_v26 }
 0x310   :  { %505 = vmatpush.msra.mxu3 %v453_v16 }
 0x312   :  { %506 = vmatpush.msra.mxu3 %v452_v29 }
 0x314   :  { %507 = vmatpush.msra.mxu3 %v451_v30 }
 0x316   :  { %508 = vmatpush.msra.mxu3 %v450_v32 }
 0x318   :  { %509 = vmatpush.msra.mxu3 %v449_v33 }
 0x31a   :  { %510 = vmatpush.msra.mxu3 %v448_v28 }
 0x31c   :  { %511 = vmatpush.msra.mxu3 %v447_v35 }
 0x31d   :  { %512 = vmatmul.f32.vlgmr.msra.gmra.mxu3 %v228_v36 }
 0x380   :  { %v434_v51 = vpop.f32.mrf.mxu3 }
 0x381   :  { %v435_v54 = vadd.f32 %v723_v52, %v434_v51 }
 0x388   :  { %v436_v53 = vpop.f32.mrf.mxu3 }
 0x389   :  { %v437_v55 = vadd.f32 %v723_v52, %v436_v53 }
 0x38b   :  { %v439_v56 = vadd.f32 %v437_v55, %v435_v54 }
 0x38d   :  { %v440_v57 = vrot.slane %v439_v56, 4 }
 0x38f   :  { %v441_v58 = vadd.f32 %v440_v57, %v439_v56 }
 0x391   :  { %v442_v59 = vrot.slane %v441_v58, 2 }
 0x393   :  { %v443_v60 = vadd.f32 %v442_v59, %v441_v58 }
 0x395   :  { %v444_v61 = vrot.slane %v443_v60, 1 }
 0x397   :  { %v445_v62 = vadd.f32 %v444_v61, %v443_v60 }
 0x399   :  { %v446_v63 = vmul.f32 0.0625, %v445_v62 }
 0x39b   :  { %552 = vmatmul.f32.vlgmr.msrb.gmra.mxu2 %v446_v63 }
 0x3a0   :  { %v513_v1 = vpop.f32.mrf.mxu3 }
 0x3a1   :  { %v514_v2 = vadd.f32 %v513_v1, %v495_v0 }
 0x3a3   :  { %v534_v4 = vadd.f32 %v533_v3, %v514_v2 }
 0x41e   :  { %v553_v5 = vpop.f32.mrf.mxu2 }
 0x41f   :  { %v554_v6 = vadd.f32 %v553_v5, %v534_v4 }
 0x421   :  { %556 = vst [vmem:[#allocation11] sm:$0x1] %v554_v6 }
 0x422   :  { %567 = dma.vmem_to_hbm [thread:$0]  %s563_s26, 16, %s565_s29, [#allocation4]  }
 0x423   :  { %874 = dma.done.wait [#allocation4], 16  }
 0x424   :  { %875 = vsyncadd [#allocation4], 4294967280 }
 0x425   :  { %572 = vsyncpa [#allocation3], 1 }
 0x426   :  { %573 = vsyncpa [#allocation6], 1 }
 0x427   :  { %574 = vsyncpa [#allocation9], 1 }
 0x428   :  { %575 = vsyncpa [#allocation4], 1 }

</bundles_post_ra>
